<compile_context>
chip_gen: v7x
topology: tpu7x:2x2x1
jax: 0.10.0
libtpu: 0.0.40
codegen_flags: <defaults>
</compile_context>

<pallas_src>
import functools

import jax
import jax.numpy as jnp
from jax.experimental import pallas as pl
from jax.experimental.pallas import tpu as pltpu


def _prob_kernel(x_ref, w_ref, b_ref, o_ref, *, ensemble_size, output_size):
    # Single GEMM over the fused ensemble axis: [Bt, I] @ [I, E*O] -> [Bt, E*O]
    y = jnp.dot(x_ref[...], w_ref[...], preferred_element_type=jnp.float32)
    y = y + b_ref[...].astype(jnp.float32)
    y = jnp.maximum(y, 0.0)  # per-member ReLU (typ == 'prob')

    # Mean over ensemble members: unrolled static-slice sum (E is small).
    O = output_size
    acc = y[:, 0:O]
    for e in range(1, ensemble_size):
        acc = acc + y[:, e * O:(e + 1) * O]
    o_ref[...] = (acc * (1.0 / ensemble_size)).astype(o_ref.dtype)


def _score_kernel(x_ref, w_ref, b_ref, o_ref):
    # Ensemble already averaged into the weights: plain Linear + ReLU.
    y = jnp.dot(x_ref[...], w_ref[...], preferred_element_type=jnp.float32)
    y = y + b_ref[...].astype(jnp.float32)
    o_ref[...] = jnp.maximum(y, 0.0).astype(o_ref.dtype)


def ensemble_layer(x, weights, biases, *, typ, block_b=256):
    """Pallas forward pass of EnsembleLayer.

    Args:
      x:       [B, I] float32
      weights: [E, I, O] float32  (torch Linear weight [O, I] transposed)
      biases:  [E, O] float32
      typ:     'prob' or 'score'
      block_b: batch tile size (only used when B > block_b)
    Returns:
      [B, O] float32
    """
    if typ not in ("prob", "score"):
        raise NotImplementedError("Choose type from {'score', 'prob'}")

    B, I = x.shape
    E, I2, O = weights.shape
    assert I == I2 and biases.shape == (E, O)

    if typ == "score":
        # Algebraic collapse: relu(mean_e(x@W_e+b_e)) == relu(x@mean_e(W_e)+mean_e(b_e))
        w = jnp.mean(weights, axis=0)                       # [I, O]
        b = jnp.mean(biases, axis=0).reshape(1, O)          # [1, O]
        kernel = _score_kernel
        n_cols = O
    else:  # 'prob'
        # Fold the ensemble into the GEMM N dimension: column e*O + o <- W[e, :, o].
        w = jnp.transpose(weights, (1, 0, 2)).reshape(I, E * O)   # [I, E*O]
        b = biases.reshape(1, E * O)                              # [1, E*O]
        kernel = functools.partial(_prob_kernel, ensemble_size=E, output_size=O)
        n_cols = E * O

    # Batch tiling: full-array block when B is small, otherwise 8-aligned tiles.
    bt = B if B <= block_b else block_b
    grid = (pl.cdiv(B, bt),)

    return pl.pallas_call(
        kernel,
        out_shape=jax.ShapeDtypeStruct((B, O), x.dtype),
        grid_spec=pltpu.PrefetchScalarGridSpec(
            num_scalar_prefetch=0,
            grid=grid,
            in_specs=[
                pl.BlockSpec((bt, I), lambda i: (i, 0)),       # x batch tile
                pl.BlockSpec((I, n_cols), lambda i: (0, 0)),   # fused / averaged W
                pl.BlockSpec((1, n_cols), lambda i: (0, 0)),   # fused / averaged b
            ],
            out_specs=pl.BlockSpec((bt, O), lambda i: (i, 0)),
        ),
        compiler_params=pltpu.CompilerParams(
            dimension_semantics=("parallel",),  # batch tiles are independent
        ),
    )(x, w, b)


def _reference(x, weights, biases, *, typ):
    # Pure-JAX reference matching the PyTorch semantics.
    y = jnp.einsum("bi,eio->ebo", x, weights) + biases[:, None, :]  # [E, B, O]
    if typ == "prob":
        y = jnp.maximum(y, 0.0)
    out = jnp.mean(y, axis=0)
    if typ == "score":
        out = jnp.maximum(out, 0.0)
    return out


if __name__ == "__main__":
    # Deterministic parameter / input construction (synthetic, no checkpoint).
    INPUT_SIZE = 32
    OUTPUT_SIZE = 16    # # tasks / classes
    ENSEMBLE_SIZE = 5

    key = jax.random.PRNGKey(0)
    kx, kw, kb, kx2 = jax.random.split(key, 4)

    # torch nn.Linear weight shape is [O, I]; stored pre-transposed as [E, I, O].
    weights = jax.random.normal(
        kw, (ENSEMBLE_SIZE, INPUT_SIZE, OUTPUT_SIZE), dtype=jnp.float32
    ) * (1.0 / jnp.sqrt(INPUT_SIZE))
    biases = jax.random.normal(
        kb, (ENSEMBLE_SIZE, OUTPUT_SIZE), dtype=jnp.float32
    ) * 0.1

    ok = True

    # Small-batch case (single block, grid of 1).
    x_small = jax.random.normal(kx, (2, INPUT_SIZE), dtype=jnp.float32)
    for typ in ("prob", "score"):
        out = jax.block_until_ready(ensemble_layer(x_small, weights, biases, typ=typ))
        ref = _reference(x_small, weights, biases, typ=typ)
        if not jnp.allclose(out, ref, atol=1e-5, rtol=1e-5):
            ok = False

    # Larger batch to exercise the parallel batch-tiled grid.
    x_big = jax.random.normal(kx2, (64, INPUT_SIZE), dtype=jnp.float32)
    for typ in ("prob", "score"):
        out = jax.block_until_ready(
            ensemble_layer(x_big, weights, biases, typ=typ, block_b=32)
        )
        ref = _reference(x_big, weights, biases, typ=typ)
        if not jnp.allclose(out, ref, atol=1e-5, rtol=1e-5):
            ok = False

    if ok:
        print("KERNEL_OK")
</pallas_src>

<mosaic_0001>
module attributes {stable_mosaic.version = 11 : i64} {
  func.func @_prob_kernel(%arg0: i32, %arg1: memref<2x32xf32, #tpu.memory_space<vmem>>, %arg2: memref<32x80xf32, #tpu.memory_space<vmem>>, %arg3: memref<1x80xf32, #tpu.memory_space<vmem>>, %arg4: memref<2x16xf32, #tpu.memory_space<vmem>>) attributes {dimension_semantics = [#tpu.dimension_semantics<parallel>], iteration_bounds = array<i64: 1>, scalar_prefetch = 0 : i64, scratch_operands = 0 : i64, tpu.core_type = #tpu.core_type<tc>, window_params = [{transform_indices = @transform_0, window_bounds = array<i64: 2, 32>}, {pipeline_mode = #tpu.pipeline_mode<synchronous>, transform_indices = @transform_1, window_bounds = array<i64: 32, 80>}, {pipeline_mode = #tpu.pipeline_mode<synchronous>, transform_indices = @transform_2, window_bounds = array<i64: 1, 80>}, {transform_indices = @transform_3, window_bounds = array<i64: 2, 16>}]} {
    %c0 = arith.constant 0 : index
    %c0_0 = arith.constant 0 : index
    %0 = vector.load %arg1[%c0, %c0_0] : memref<2x32xf32, #tpu.memory_space<vmem>>, vector<2x32xf32>
    %c0_1 = arith.constant 0 : index
    %c0_2 = arith.constant 0 : index
    %1 = vector.load %arg2[%c0_1, %c0_2] : memref<32x80xf32, #tpu.memory_space<vmem>>, vector<32x80xf32>
    %cst = arith.constant dense<0.000000e+00> : vector<2x80xf32>
    %2 = tpu.matmul %0, %1, %cst {dimension_numbers = #tpu.dot_dimension_numbers<[1], [0], [0], [1], [0, 0, 1, 1], [], []>} : vector<2x32xf32>, vector<32x80xf32>, vector<2x80xf32> -> vector<2x80xf32>
    %c0_3 = arith.constant 0 : index
    %c0_4 = arith.constant 0 : index
    %3 = vector.load %arg3[%c0_3, %c0_4] : memref<1x80xf32, #tpu.memory_space<vmem>>, vector<1x80xf32>
    %4 = vector.broadcast %3 : vector<1x80xf32> to vector<2x80xf32>
    %5 = arith.addf %2, %4 : vector<2x80xf32>
    %cst_5 = arith.constant 0.000000e+00 : f32
    %6 = vector.broadcast %cst_5 : f32 to vector<2x80xf32>
    %7 = arith.maximumf %5, %6 : vector<2x80xf32>
    %8 = vector.extract_strided_slice %7 {offsets = [0, 0], sizes = [2, 16], strides = [1, 1]} : vector<2x80xf32> to vector<2x16xf32>
    %9 = vector.extract_strided_slice %7 {offsets = [0, 16], sizes = [2, 16], strides = [1, 1]} : vector<2x80xf32> to vector<2x16xf32>
    %10 = arith.addf %8, %9 : vector<2x16xf32>
    %11 = vector.extract_strided_slice %7 {offsets = [0, 32], sizes = [2, 16], strides = [1, 1]} : vector<2x80xf32> to vector<2x16xf32>
    %12 = arith.addf %10, %11 : vector<2x16xf32>
    %13 = vector.extract_strided_slice %7 {offsets = [0, 48], sizes = [2, 16], strides = [1, 1]} : vector<2x80xf32> to vector<2x16xf32>
    %14 = arith.addf %12, %13 : vector<2x16xf32>
    %15 = vector.extract_strided_slice %7 {offsets = [0, 64], sizes = [2, 16], strides = [1, 1]} : vector<2x80xf32> to vector<2x16xf32>
    %16 = arith.addf %14, %15 : vector<2x16xf32>
    %cst_6 = arith.constant 2.000000e-01 : f32
    %17 = vector.broadcast %cst_6 : f32 to vector<2x16xf32>
    %18 = arith.mulf %16, %17 : vector<2x16xf32>
    %c0_7 = arith.constant 0 : index
    %c0_8 = arith.constant 0 : index
    %19 = vector.load %arg4[%c0_7, %c0_8] : memref<2x16xf32, #tpu.memory_space<vmem>>, vector<2x16xf32>
    tpu.vector_store %arg4[%c0_7, %c0_8], %18 {strides = array<i32>} : memref<2x16xf32, #tpu.memory_space<vmem>>, vector<2x16xf32>,
    return
  }
  func.func @transform_0(%arg0: i32) -> (i32, i32) {
    %c0_i32 = arith.constant 0 : i32
    %c0_i32_0 = arith.constant 0 : i32
    return %arg0, %c0_i32 : i32, i32
  }
  func.func @transform_1(%arg0: i32) -> (i32, i32) {
    %c0_i32 = arith.constant 0 : i32
    %c0_i32_0 = arith.constant 0 : i32
    %c0_i32_1 = arith.constant 0 : i32
    return %c0_i32, %c0_i32_0 : i32, i32
  }
  func.func @transform_2(%arg0: i32) -> (i32, i32) {
    %c0_i32 = arith.constant 0 : i32
    %c0_i32_0 = arith.constant 0 : i32
    %c0_i32_1 = arith.constant 0 : i32
    return %c0_i32, %c0_i32_0 : i32, i32
  }
  func.func @transform_3(%arg0: i32) -> (i32, i32) {
    %c0_i32 = arith.constant 0 : i32
    %c0_i32_0 = arith.constant 0 : i32
    return %arg0, %c0_i32 : i32, i32
  }
}

</mosaic_0001>

<bundles_post_ra>
// kernel: tpu_custom_call.1
= control target key start
LH: loop header
LB: loop body
LE: loop exit
PB: predicated region body
PF: predicated region fallthrough
CT: control target
= control target key end

     0   :  { %8 = vsyncpa [#allocation3], 0  ;;  %s350_s0 = inlined_call_operand.hbm [shape: f32[2,32], index: 0, kind: input, shape index: {}]   ;;  %s351_s1 = inlined_call_operand.hbm [shape: f32[32,80], index: 1, kind: input, shape index: {}]   ;;  %s352_s2 = inlined_call_operand.vmem [shape: f32[1,80], index: 2, kind: input, shape index: {}]   ;;  %s353_s3 = inlined_call_operand.hbm [shape: f32[2,16], index: 3, kind: output, shape index: {}]  }
   0x1   :  { %9 = vsyncpa [#allocation6], 0 }
   0x2   :  { %10 = vsyncpa [#allocation4], 0  ;;  %s272_s12 = smov [#allocation2]   ;;  %s273_s14 = smov [#allocation5]  }
   0x3   :  { %s17_s13 = sshll.u32 %s272_s12, 4  ;;  %s26_s15 = sshll.u32 %s273_s14, 4  ;;  %s18_s13 = int_to_ptr.vmem [resolvable:$true] %s17_s13  ;;  %s304_s15 = int_to_ptr.vmem [resolvable:$true] %s26_s15 }
   0x4   :  { %s200_s18 = scalar_lea.hbm %s350_s0, 32 }
   0x5   :  { %p201_p0 = scmp.ne.s32.totalorder %s350_s0, %s200_s18  ;;  %p204_p1 = scmp.lt.u32.totalorder %s200_s18, %s350_s0 }
   0x7   :  { %p206_p2 = pnand %p204_p1, %p201_p0 }
   0x9   :  { %209 = shalt.err (!%p206_p2)
}
   0xa   :  { %s210_s23 = scalar_lea.vmem %s18_s13, 32  ;;  %p215_p4 = scmp.lt.s32.totalorder %s18_s13, %s18_s13 }
   0xb   :  { %p211_p3 = scmp.ne.s32.totalorder %s18_s13, %s210_s23  ;;  %p216_p5 = scmp.lt.s32.totalorder %s210_s23, %s210_s23 }
   0xd   :  { %p217_p6 = por %p216_p5, %p215_p4 }
   0xf   :  { %p218_p7 = pnand %p217_p6, %p211_p3 }
  0x11   :  { %221 = shalt.err (!%p218_p7)
}
  0x12   :  { %20 = dma.hbm_to_vmem [thread:$0]  %s350_s0, 32, %s18_s13, [#allocation3]  }
  0x13   :  { %s222_s28 = scalar_lea.hbm %s351_s1, 512 }
  0x14   :  { %p223_p8 = scmp.ne.s32.totalorder %s351_s1, %s222_s28  ;;  %p226_p9 = scmp.lt.u32.totalorder %s222_s28, %s351_s1 }
  0x16   :  { %p228_p10 = pnand %p226_p9, %p223_p8 }
  0x18   :  { %231 = shalt.err (!%p228_p10)
}
  0x19   :  { %s232_s6 = scalar_lea.vmem %s304_s15, 512  ;;  %p237_p12 = scmp.lt.s32.totalorder %s304_s15, %s304_s15 }
  0x1a   :  { %p233_p11 = scmp.ne.s32.totalorder %s304_s15, %s232_s6  ;;  %p238_p13 = scmp.lt.s32.totalorder %s232_s6, %s232_s6 }
  0x1c   :  { %p239_p0 = por %p238_p13, %p237_p12 }
  0x1e   :  { %p240_p1 = pnand %p239_p0, %p233_p11 }
  0x20   :  { %243 = shalt.err (!%p240_p1)
}
  0x21   :  { %s274_s0 = smov 128   ;;  %s275_s7 = smov 8  }
  0x22   :  { %32 = dma.hbm_to_vmem [thread:$0]  %s351_s1, 512, %s304_s15, [#allocation6], %s274_s0, %s274_s0, %s275_s7  }
  0x23   :  { %266 = dma.done.wait [#allocation3], 32  }
  0x24   :  { %267 = vsyncadd [#allocation3], 4294967264 }
  0x25   :  { %268 = dma.done.wait [#allocation6], 512  }
  0x26   :  { %269 = vsyncadd [#allocation6], 4294966784  ;;  %v276_v0 = vmov 0.0|0.0   ;;  %vm277_vm0 = vmmov 0   ;;  %v278_v1 = vmov 0.0   ;;  %v42_v2 = vld [vmem:[#allocation5] sm:$0xff] }
  0x27   :  { %182 = vmatprep.subr.bf16.mxu0 %v276_v0  ;;  %179 = vmatprep.mubr.msk.f32.mxu0 %vm277_vm0, %v278_v1  ;;  %v43_v3 = vld [vmem:[#allocation5 + $0x8] sm:$0xff]  ;;  %v44_v4 = vld [vmem:[#allocation5 + $0x10] sm:$0xff]  ;;  %v45_v6 = vld [vmem:[#allocation5 + $0x18] sm:$0xff]  ;;  %vm53_vm1 = vcmask 261120   ;;  %s279_s11 = smov 80   ;;  %s280_s12 = smov 112  }
  0x28   :  { %v183_v5 = vpack.c.bf16 %v43_v3, %v42_v2  ;;  %v186_v7 = vpack.c.bf16 %v45_v6, %v44_v4  ;;  %v41_v8 = vld [vmem:[#allocation2] sm:$0x3]  ;;  %s281_s13 = smov 64   ;;  %s282_s14 = smov 96   ;;  %vm146_vm2 = vcmask 123904  }
  0x29   :  { %v164_v9 = vld [vmem:[%s352_s2] ss:$0 sm:$0xff]  ;;  %s283_s2 = smov [#allocation7]  }
  0x2a   :  { %184 = vmatpush3.bf16.msra.mxu0 %v183_v5  ;;  %s154_s15 = sshll.u32 %s283_s2, 4  ;;  %s155_s15 = int_to_ptr.vmem [resolvable:$true] %s154_s15 }
  0x2b   :  { %185 = vmatprep.subr.bf16.mxu0 %v276_v0  ;;  %s244_s16 = scalar_lea.vmem %s155_s15, 32  ;;  %p249_p3 = scmp.lt.s32.totalorder %s155_s15, %s155_s15 }
  0x2c   :  { %p245_p2 = scmp.ne.s32.totalorder %s155_s15, %s244_s16  ;;  %p250_p4 = scmp.lt.s32.totalorder %s244_s16, %s244_s16 }
  0x2e   :  { %187 = vmatpush3.bf16.msra.mxu0 %v186_v7  ;;  %p251_p5 = por %p250_p4, %p249_p3 }
  0x30   :  { %p252_p6 = pnand %p251_p5, %p245_p2 }
  0x31   :  { %180 = vmatmul.mubr.msk.f32.vlgmr.msra.gmra.mrb[0].mxu0 %vm53_vm1, %v41_v8 }
 0x104   :  { %v123_v10 = vpop.f32.mrb[0].mxu0 }
 0x105   :  { %v124_v11 = vadd.f32 %v164_v9, %v123_v10  ;;  %v181_v12 = vpop.f32.mrb[1].mxu0 }
 0x107   :  { %v127_v13 = vmax.f32 %v124_v11, 0.0 }
 0x109   :  { %137 = vrot.lane.b32.xlu1 %v127_v13, %s279_s11  ;;  %129 = vrot.lane.b32.xlu0 %v127_v13, %s280_s12 }
 0x10d   :  { %141 = vrot.lane.b32.xlu1 %v127_v13, %s281_s13  ;;  %133 = vrot.lane.b32.xlu0 %v127_v13, %s282_s14 }
 0x17b   :  { %v130_v14 = vpop.permute.xlu0 %129  ;;  %v138_v15 = vpop.permute.xlu1 %137 }
 0x17c   :  { %v132_v16 = vadd.f32 %v130_v14, %v127_v13 }
 0x17f   :  { %v134_v17 = vpop.permute.xlu0 %133  ;;  %v142_v20 = vpop.permute.xlu1 %141 }
 0x180   :  { %v136_v18 = vadd.f32 %v134_v17, %v132_v16 }
 0x182   :  { %v140_v19 = vadd.f32 %v138_v15, %v136_v18 }
 0x184   :  { %v144_v21 = vadd.f32 %v142_v20, %v140_v19 }
 0x186   :  { %v145_v22 = vmul.f32 0.2, %v144_v21 }
 0x188   :  { %147 = vst.msk [vmem:[#allocation7] sm:$0x3] %vm146_vm2, %v145_v22 }
 0x189   :  { %255 = shalt.err (!%p252_p6)
}
 0x18a   :  { %s256_s19 = scalar_lea.hbm %s353_s3, 32 }
 0x18b   :  { %p257_p7 = scmp.ne.s32.totalorder %s353_s3, %s256_s19  ;;  %p260_p8 = scmp.lt.u32.totalorder %s256_s19, %s353_s3 }
 0x18d   :  { %p262_p9 = pnand %p260_p8, %p257_p7 }
 0x18f   :  { %265 = shalt.err (!%p262_p9)
}
 0x190   :  { %157 = dma.vmem_to_hbm [thread:$0]  %s155_s15, 32, %s353_s3, [#allocation4]  }
 0x191   :  { %270 = dma.done.wait [#allocation4], 32  }
 0x192   :  { %271 = vsyncadd [#allocation4], 4294967264 }
 0x193   :  { %161 = vsyncpa [#allocation3], 1 }
 0x194   :  { %162 = vsyncpa [#allocation6], 1 }
 0x195   :  { %163 = vsyncpa [#allocation4], 1 }

</bundles_post_ra>
